<compile_context>
chip_gen: v5e
topology: v5e:2x2
jax: 0.10.0
libtpu: 0.0.40
codegen_flags: <defaults>
</compile_context>

<pallas_src>
import jax
import jax.numpy as jnp
from jax.experimental import pallas as pl
from jax.experimental.pallas import tpu as pltpu


# 6 MiB blocks x 2 streams (x, out) x 2 pipeline buffers ~= 24 MiB of scoped
# VMEM (+ tiny scale/bias columns).  Raise the scoped limit explicitly so this
# works on every generation: v5e default is only 16 MiB, v6e 32 MiB, v7x
# 32 MiB default / 64 MiB physical.  48 MiB is < physical VMEM everywhere.
_TARGET_BLOCK_BYTES = 6 * 1024 * 1024
_VMEM_LIMIT_BYTES = 48 * 1024 * 1024
# Make sure the "parallel" grid has enough steps for v7x megacore (2 TCs);
# v5e/v6e (1 TC) are unaffected.
_MIN_GRID_STEPS = 8


def _normalize_kernel(scale_ref, bias_ref, x_ref, o_ref):
    # scale/bias: (row_tile, 1) f32 columns, lane-broadcast against the tile.
    # x/o: (row_tile, col_tile).  Pure fused multiply-add on the 4-wide VALU
    # slots; hides entirely under the DMA for this mem-bound kernel.
    o_ref[...] = (x_ref[...] * scale_ref[...] + bias_ref[...]).astype(o_ref.dtype)


def _pick_tile(full, unit, max_tile_elems):
    """Pick a tile size along one dim.

    Returns either the full extent (always a legal block) or a multiple of
    `unit`, never exceeding the byte-budget-derived `max_tile_elems`.  If the
    tile does not divide `full`, the grid uses pl.cdiv and Pallas masks the
    ragged last block — so a non-aligned shape can never blow the VMEM budget.
    """
    max_tile = max(unit, (max_tile_elems // unit) * unit)
    if full <= max_tile:
        return full  # full-extent block: always legal, within budget
    # Prefer a tile that divides `full` evenly (no ragged last block); bounded
    # search, then fall back to the budget-sized tile + cdiv grid.
    t = max_tile
    for _ in range(64):
        if full % t == 0:
            return t
        t -= unit
        if t < unit:
            break
    return max_tile


def normalize(x, mean, std, *, donate=False):
    """(x - mean[None,:,None,None]) / std[None,:,None,None] for NCHW x."""
    N, C, H, W = x.shape
    rows, cols = N * C, H * W
    x2 = x.reshape(rows, cols)
    itemsize = jnp.dtype(x.dtype).itemsize

    # Per-channel scale/bias (only C values computed), replicated per row of
    # the flattened (N*C, H*W) view: row r corresponds to channel r % C.
    # Kept in f32 so the FMA is exact-ish on every generation (v5e has no
    # bf16 VALU anyway).
    scale_c = 1.0 / jnp.asarray(std, dtype=jnp.float32)
    bias_c = -jnp.asarray(mean, dtype=jnp.float32) * scale_c
    scale = jnp.tile(scale_c, N).reshape(rows, 1)
    bias = jnp.tile(bias_c, N).reshape(rows, 1)

    # Dtype-aware sublane packing: 8 rows (f32), 16 (bf16), 32 (int8/fp8).
    row_unit = max(8, 32 // itemsize)

    # Lane-dense last dim first (multiple of 128 whenever possible), then rows.
    col_tile = _pick_tile(
        cols, 128, max(128, _TARGET_BLOCK_BYTES // (row_unit * itemsize))
    )
    max_rows = max(row_unit, _TARGET_BLOCK_BYTES // max(1, col_tile * itemsize))
    row_tile = _pick_tile(rows, row_unit, max_rows)

    # Megacore: if the grid collapsed to a handful of steps, shrink row_tile
    # (keeping cols lane-dense) so both v7x TensorCores have work.
    def _n_steps(rt, ct):
        return pl.cdiv(rows, rt) * pl.cdiv(cols, ct)

    while (
        _n_steps(row_tile, col_tile) < _MIN_GRID_STEPS
        and row_tile > row_unit
        and row_tile % row_unit == 0
    ):
        new_rt = max(row_unit, ((row_tile // 2) // row_unit) * row_unit)
        if new_rt == row_tile:
            break
        row_tile = new_rt

    grid = (pl.cdiv(rows, row_tile), pl.cdiv(cols, col_tile))

    # Pure HBM-bandwidth op: tell XLA its true byte cost so the surrounding
    # program can schedule/overlap around it.
    cost = pl.CostEstimate(
        flops=2 * rows * cols,
        transcendentals=0,
        bytes_accessed=int(2 * rows * cols * itemsize + 2 * rows * 4),
    )

    kwargs = dict(cost_estimate=cost)
    if donate:
        # x2 is input index 2; reuse its HBM buffer for the output when the
        # caller donates x.
        kwargs["input_output_aliases"] = {2: 0}

    out2 = pl.pallas_call(
        _normalize_kernel,
        out_shape=jax.ShapeDtypeStruct((rows, cols), x.dtype),
        grid_spec=pltpu.PrefetchScalarGridSpec(
            num_scalar_prefetch=0,
            grid=grid,
            in_specs=[
                pl.BlockSpec((row_tile, 1), lambda i, j: (i, 0)),         # scale
                pl.BlockSpec((row_tile, 1), lambda i, j: (i, 0)),         # bias
                pl.BlockSpec((row_tile, col_tile), lambda i, j: (i, j)),  # x
            ],
            out_specs=pl.BlockSpec((row_tile, col_tile), lambda i, j: (i, j)),
        ),
        compiler_params=pltpu.CompilerParams(
            dimension_semantics=("parallel", "parallel"),
            vmem_limit_bytes=_VMEM_LIMIT_BYTES,
        ),
        # TODO(synk): optionally sweep pipeline_mode=pl.Buffered(3) on x/out
        # BlockSpecs for v7x's faster HBM.
        **kwargs,
    )(scale, bias, x2)

    return out2.reshape(N, C, H, W)


if __name__ == "__main__":
    key = jax.random.PRNGKey(0)
    # Module hardcodes 3 channels via reshape(1, 3, 1, 1).
    N, C, H, W = 2, 3, 16, 16
    x = jax.random.normal(key, (N, C, H, W), dtype=jnp.float32)

    # Deterministic "buffer" initialization (ImageNet-style constants).
    mean = jnp.array([0.485, 0.456, 0.406], dtype=jnp.float32)
    std = jnp.array([0.229, 0.224, 0.225], dtype=jnp.float32)

    out = normalize(x, mean, std)
    out = jax.block_until_ready(out)

    # Reference check in plain JAX (true division). The fused x*(1/std) + bias
    # path differs by at most ~1 ulp, covered by the 1e-5 tolerance.
    ref = (x - mean.reshape(1, 3, 1, 1)) / std.reshape(1, 3, 1, 1)
    assert out.shape == (N, C, H, W)
    assert jnp.allclose(out, ref, atol=1e-5, rtol=1e-5)

    print("KERNEL_OK")
</pallas_src>

<mosaic_0001>
module attributes {stable_mosaic.version = 11 : i64} {
  func.func @_normalize_kernel(%arg0: i32, %arg1: i32, %arg2: memref<6x1xf32, #tpu.memory_space<vmem>>, %arg3: memref<6x1xf32, #tpu.memory_space<vmem>>, %arg4: memref<6x256xf32, #tpu.memory_space<vmem>>, %arg5: memref<6x256xf32, #tpu.memory_space<vmem>>) attributes {dimension_semantics = [#tpu.dimension_semantics<parallel>, #tpu.dimension_semantics<parallel>], iteration_bounds = array<i64: 1, 1>, scalar_prefetch = 0 : i64, scratch_operands = 0 : i64, tpu.core_type = #tpu.core_type<tc>, window_params = [{transform_indices = @transform_0, window_bounds = array<i64: 6, 1>}, {transform_indices = @transform_1, window_bounds = array<i64: 6, 1>}, {transform_indices = @transform_2, window_bounds = array<i64: 6, 256>}, {transform_indices = @transform_3, window_bounds = array<i64: 6, 256>}]} {
    %c0 = arith.constant 0 : index
    %c0_0 = arith.constant 0 : index
    %0 = vector.load %arg4[%c0, %c0_0] : memref<6x256xf32, #tpu.memory_space<vmem>>, vector<6x256xf32>
    %c0_1 = arith.constant 0 : index
    %c0_2 = arith.constant 0 : index
    %1 = vector.load %arg2[%c0_1, %c0_2] : memref<6x1xf32, #tpu.memory_space<vmem>>, vector<6x1xf32>
    %2 = vector.broadcast %1 : vector<6x1xf32> to vector<6x256xf32>
    %3 = arith.mulf %0, %2 : vector<6x256xf32>
    %c0_3 = arith.constant 0 : index
    %c0_4 = arith.constant 0 : index
    %4 = vector.load %arg3[%c0_3, %c0_4] : memref<6x1xf32, #tpu.memory_space<vmem>>, vector<6x1xf32>
    %5 = vector.broadcast %4 : vector<6x1xf32> to vector<6x256xf32>
    %6 = arith.addf %3, %5 : vector<6x256xf32>
    %c0_5 = arith.constant 0 : index
    %c0_6 = arith.constant 0 : index
    %7 = vector.load %arg5[%c0_5, %c0_6] : memref<6x256xf32, #tpu.memory_space<vmem>>, vector<6x256xf32>
    tpu.vector_store %arg5[%c0_5, %c0_6], %6 {strides = array<i32>} : memref<6x256xf32, #tpu.memory_space<vmem>>, vector<6x256xf32>,
    return
  }
  func.func @transform_0(%arg0: i32, %arg1: i32) -> (i32, i32) {
    %c0_i32 = arith.constant 0 : i32
    %c0_i32_0 = arith.constant 0 : i32
    return %arg0, %c0_i32 : i32, i32
  }
  func.func @transform_1(%arg0: i32, %arg1: i32) -> (i32, i32) {
    %c0_i32 = arith.constant 0 : i32
    %c0_i32_0 = arith.constant 0 : i32
    return %arg0, %c0_i32 : i32, i32
  }
  func.func @transform_2(%arg0: i32, %arg1: i32) -> (i32, i32) {
    %c0_i32 = arith.constant 0 : i32
    return %arg0, %arg1 : i32, i32
  }
  func.func @transform_3(%arg0: i32, %arg1: i32) -> (i32, i32) {
    %c0_i32 = arith.constant 0 : i32
    return %arg0, %arg1 : i32, i32
  }
}

</mosaic_0001>

<bundles_post_ra>
// kernel: tpu_custom_call.1
= control target key start
LH: loop header
LB: loop body
LE: loop exit
PB: predicated region body
PF: predicated region fallthrough
CT: control target
= control target key end

     0   :  { %v80_v1 = vmov 0   ;;  %s117_s0 = inlined_call_operand.vmem [shape: f32[6,1], index: 0, kind: input, shape index: {}]   ;;  %s118_s1 = inlined_call_operand.vmem [shape: f32[6,1], index: 1, kind: input, shape index: {}]   ;;  %s119_s2 = inlined_call_operand.vmem [shape: f32[6,256], index: 2, kind: input, shape index: {}]   ;;  %s120_s3 = inlined_call_operand.hbm [shape: f32[6,256], index: 3, kind: output, shape index: {}]  }
   0x1   :  { %v17_v0 = vld [vmem:[%s117_s0] sm:$0x3f]  ;;  %53 = vset.pattern.permute.xlu0 %v80_v1 }
   0x2   :  { %8 = vsyncpa [#allocation3], 0  ;;  %20 = vperm.xlu0 %53, %v17_v0   ;;  %v25_v2 = vld [vmem:[%s118_s1] sm:$0x3f]  ;;  %v16_v5 = vld [vmem:[%s119_s2 + $0x8] sm:$0x3f] }
   0x3   :  { %v15_v4 = vld [vmem:[%s119_s2] sm:$0x3f]  ;;  %s81_s0 = smov [#allocation2]   ;;  %s42_s23 = sshll.u32 %s120_s3, 4  ;;  %s43_s23 = int_to_ptr.hbm [resolvable:$true] %s42_s23 }
   0x4   :  { %s40_s20 = sshll.u32 %s81_s0, 4  ;;  %s41_s20 = int_to_ptr.vmem [resolvable:$true] %s40_s20 }
   0xa   :  { %28 = vperm.xlu0 %53, %v25_v2  }
  0x74   :  { %v21_v3 = vpop.permute.xlu0 %20 }
  0x75   :  { %v23_v6 = vmul.f32 %v21_v3, %v15_v4  ;;  %v24_v7 = vmul.f32 %v21_v3, %v16_v5 }
  0x7c   :  { %v29_v8 = vpop.permute.xlu0 %28 }
  0x7d   :  { %v31_v9 = vadd.f32 %v29_v8, %v23_v6  ;;  %v32_v10 = vadd.f32 %v29_v8, %v24_v7 }
  0x7f   :  { %33 = vst [vmem:[#allocation2] sm:$0x3f] %v31_v9 }
  0x80   :  { %34 = vst [vmem:[#allocation2 + $0x8] sm:$0x3f] %v32_v10 }
  0x81   :  { %45 = dma.vmem_to_hbm [thread:$0]  %s41_s20, 256, %s43_s23, [#allocation3]  }
  0x82   :  { %78 = dma.done.wait [#allocation3], 256  }
  0x83   :  { %79 = vsyncadd [#allocation3], 4294967040 }
  0x84   :  { %50 = vsyncpa [#allocation3], 1 }

</bundles_post_ra>
